<compile_context>
chip_gen: v5e
topology: v5e:2x2
jax: 0.10.0
libtpu: 0.0.40
codegen_flags: <defaults>
</compile_context>

<pallas_src>
import functools

import jax
import jax.numpy as jnp
from jax.experimental import pallas as pl
from jax.experimental.pallas import tpu as pltpu


def _encoder_mlp_kernel(x_ref, w1_ref, b1_ref, w2_ref, b2_ref, z_ref):
    # x_ref:  (TM, D_IN)  f32 flattened-input batch tile (bf16 cast happens here,
    #                     so x only crosses HBM once, as f32)
    # w1_ref: (D_IN, HID) bf16 first linear weight  (VMEM-resident across grid steps)
    # b1_ref: (1, HID)    f32 first linear bias
    # w2_ref: (HID, ENC)  bf16 second linear weight (VMEM-resident)
    # b2_ref: (1, ENC)    f32 second linear bias
    # z_ref:  (TM, ENC)   f32 latent tile (zs ++ zy); split happens in the wrapper
    x_bf = x_ref[...].astype(jnp.bfloat16)               # VPU cast, hidden under x DMA
    h = jnp.dot(x_bf, w1_ref[...], preferred_element_type=jnp.float32)
    h = jnp.maximum(h + b1_ref[...], 0.0)                 # bias add + ReLU in f32
    z = jnp.dot(h.astype(w2_ref.dtype), w2_ref[...],
                preferred_element_type=jnp.float32)
    z_ref[...] = (z + b2_ref[...]).astype(z_ref.dtype)


def _round_up(x, m):
    return ((x + m - 1) // m) * m


@functools.partial(jax.jit, static_argnames=("zs_dim",))
def autoencoder_forward(x_nchw, w1, b1, w2, b2, *, zs_dim):
    """Pallas implementation of AutoEncoder.forward (== encode, zs_transform=none).

    Returns (zs, zy), the encoding split along dim=1.
    Weights should be passed in bf16 (cast once, outside this jitted hot path).
    """
    n = x_nchw.shape[0]
    d_in, hid = w1.shape
    enc = w2.shape[1]

    # Glue: flatten NCHW row-major to (N, C*H*W), exactly like torch .flatten(1).
    # NO dtype cast here: x goes into the kernel in its native f32.
    x2d = x_nchw.reshape(n, d_in)

    # Matmul weights on the bf16 MXU path. If the caller already passes bf16 (recommended,
    # cached parameter copies), these astypes are no-ops under jit.
    w1_bf = w1.astype(jnp.bfloat16)
    w2_bf = w2.astype(jnp.bfloat16)
    b1_2d = b1.reshape(1, hid).astype(jnp.float32)
    b2_2d = b2.reshape(1, enc).astype(jnp.float32)

    # ---- VMEM-aware batch tiling ------------------------------------------------
    x_row_bytes = d_in * x2d.dtype.itemsize              # f32 input row
    out_row_bytes = enc * 4                               # f32 output row
    # Resident weights/biases are still double-buffered by the pipeline even with a
    # constant index_map, hence the x2 on everything.
    weight_vmem = 2 * (d_in * hid * 2 + hid * enc * 2 + (hid + enc) * 4)
    row_vmem = 2 * (x_row_bytes + out_row_bytes)          # double-buffered x / out tiles

    # Budget sized for the smallest scoped-VMEM default across generations
    # (v7x: 32 MiB scoped / 64 MiB physical), with headroom for internal scratch.
    vmem_budget = 24 << 20
    # TODO(synk): add a K-tiled (d_in-split) accumulator path (f32 scratch + pl.when
    # init/finalize on an "arbitrary" K axis) for encoders whose resident weights alone
    # approach the VMEM budget.
    tm_vmem = max(16, ((vmem_budget - weight_vmem) // row_vmem) // 16 * 16)
    # >= 2 grid steps when possible (v7x dual-TC), cap at 2048 rows, 16-aligned.
    tm_batch = _round_up(-(-n // 2), 16)
    tm = max(16, min(2048, tm_vmem, tm_batch))
    grid = (pl.cdiv(n, tm),)                              # ragged last block masked by Pallas

    # Advisory cost estimate so XLA can schedule around this mem-bound call.
    flops = 2 * n * (d_in * hid + hid * enc)
    bytes_accessed = (n * x_row_bytes                     # x (f32), read exactly once
                      + d_in * hid * 2 + hid * enc * 2    # weights (bf16)
                      + (hid + enc) * 4                   # biases (f32)
                      + n * out_row_bytes)                # z out (f32)
    cost = pl.CostEstimate(flops=flops, transcendentals=0,
                           bytes_accessed=bytes_accessed)

    vmem_needed = weight_vmem + tm * row_vmem
    vmem_bytes = int(min(max(vmem_needed + (1 << 20), 4 << 20), 40 << 20))

    z = pl.pallas_call(
        _encoder_mlp_kernel,
        out_shape=jax.ShapeDtypeStruct((n, enc), jnp.float32),   # no padding, no z[:n] copy
        grid=grid,
        in_specs=[
            pl.BlockSpec((tm, d_in), lambda i: (i, 0)),      # batch-tiled f32 input
            pl.BlockSpec((d_in, hid), lambda i: (0, 0)),     # W1: resident, no re-DMA
            pl.BlockSpec((1, hid), lambda i: (0, 0)),        # b1
            pl.BlockSpec((hid, enc), lambda i: (0, 0)),      # W2: resident
            pl.BlockSpec((1, enc), lambda i: (0, 0)),        # b2
        ],
        out_specs=pl.BlockSpec((tm, enc), lambda i: (i, 0)),
        compiler_params=pltpu.CompilerParams(
            dimension_semantics=("parallel",),   # batch steps independent -> dual-TC on v7x
            vmem_limit_bytes=vmem_bytes,
        ),
        cost_estimate=cost,
    )(x2d, w1_bf, b1_2d, w2_bf, b2_2d)

    # _split_encoding: z.split((zs, zy), dim=1); kept outside the kernel so the kernel
    # output stays lane-dense (ENC=128 -> unmasked stores).
    zs = z[:, :zs_dim]
    zy = z[:, zs_dim:]
    # zs_transform is ZsTransform.none -> identity (no sigmoid/round-STE).
    return zs, zy


if __name__ == "__main__":
    # Small, deterministic example shapes.
    B, C, H, W = 2, 4, 16, 16          # input images, NCHW
    D_IN = C * H * W                    # 1024
    HID = 128                           # encoder hidden width
    ZS, ZY = 32, 96                     # EncodingSize(zs=32, zy=96)
    ENC = ZS + ZY                       # 128

    key = jax.random.PRNGKey(0)
    kx, k1, k2, k3, k4 = jax.random.split(key, 5)

    x = jax.random.normal(kx, (B, C, H, W), dtype=jnp.float32)
    # Deterministic parameter init (synthetic weights, not a checkpoint).
    w1 = jax.random.normal(k1, (D_IN, HID), dtype=jnp.float32) * 0.02
    b1 = jax.random.normal(k2, (HID,), dtype=jnp.float32) * 0.01
    w2 = jax.random.normal(k3, (HID, ENC), dtype=jnp.float32) * 0.02
    b2 = jax.random.normal(k4, (ENC,), dtype=jnp.float32) * 0.01

    # Cast weights to bf16 ONCE, outside the jitted hot path (cached parameter copies).
    w1_bf = w1.astype(jnp.bfloat16)
    w2_bf = w2.astype(jnp.bfloat16)

    zs, zy = autoencoder_forward(x, w1_bf, b1, w2_bf, b2, zs_dim=ZS)
    jax.block_until_ready((zs, zy))

    # Cross-check against a pure-JAX f32 reference of the same forward pass.
    # bf16 matmul operands with f32 accumulation -> relaxed tolerance.
    x2d = x.reshape(B, D_IN)
    z_ref = jnp.maximum(x2d @ w1 + b1, 0.0) @ w2 + b2
    assert zs.shape == (B, ZS) and zy.shape == (B, ZY)
    assert jnp.allclose(jnp.concatenate([zs, zy], axis=1), z_ref, atol=5e-2, rtol=5e-2)

    print("KERNEL_OK")
</pallas_src>

<mosaic_0001>
module attributes {stable_mosaic.version = 11 : i64} {
  func.func @_encoder_mlp_kernel(%arg0: i32, %arg1: memref<16x1024xf32, #tpu.memory_space<vmem>>, %arg2: memref<1024x128xbf16, #tpu.memory_space<vmem>>, %arg3: memref<1x128xf32, #tpu.memory_space<vmem>>, %arg4: memref<128x128xbf16, #tpu.memory_space<vmem>>, %arg5: memref<1x128xf32, #tpu.memory_space<vmem>>, %arg6: memref<16x128xf32, #tpu.memory_space<vmem>>) attributes {dimension_semantics = [#tpu.dimension_semantics<parallel>], iteration_bounds = array<i64: 1>, scalar_prefetch = 0 : i64, scratch_operands = 0 : i64, tpu.core_type = #tpu.core_type<tc>, window_params = [{transform_indices = @transform_0, window_bounds = array<i64: 16, 1024>}, {pipeline_mode = #tpu.pipeline_mode<synchronous>, transform_indices = @transform_1, window_bounds = array<i64: 1024, 128>}, {pipeline_mode = #tpu.pipeline_mode<synchronous>, transform_indices = @transform_2, window_bounds = array<i64: 1, 128>}, {pipeline_mode = #tpu.pipeline_mode<synchronous>, transform_indices = @transform_3, window_bounds = array<i64: 128, 128>}, {pipeline_mode = #tpu.pipeline_mode<synchronous>, transform_indices = @transform_4, window_bounds = array<i64: 1, 128>}, {transform_indices = @transform_5, window_bounds = array<i64: 16, 128>}]} {
    %c0 = arith.constant 0 : index
    %c0_0 = arith.constant 0 : index
    %0 = vector.load %arg1[%c0, %c0_0] : memref<16x1024xf32, #tpu.memory_space<vmem>>, vector<16x1024xf32>
    %1 = arith.truncf %0 : vector<16x1024xf32> to vector<16x1024xbf16>
    %c0_1 = arith.constant 0 : index
    %c0_2 = arith.constant 0 : index
    %2 = vector.load %arg2[%c0_1, %c0_2] : memref<1024x128xbf16, #tpu.memory_space<vmem>>, vector<1024x128xbf16>
    %cst = arith.constant dense<0.000000e+00> : vector<16x128xf32>
    %3 = tpu.matmul %1, %2, %cst {dimension_numbers = #tpu.dot_dimension_numbers<[1], [0], [0], [1], [0, 0, 1, 1], [], []>} : vector<16x1024xbf16>, vector<1024x128xbf16>, vector<16x128xf32> -> vector<16x128xf32>
    %c0_3 = arith.constant 0 : index
    %c0_4 = arith.constant 0 : index
    %4 = vector.load %arg3[%c0_3, %c0_4] : memref<1x128xf32, #tpu.memory_space<vmem>>, vector<1x128xf32>
    %5 = vector.broadcast %4 : vector<1x128xf32> to vector<16x128xf32>
    %6 = arith.addf %3, %5 : vector<16x128xf32>
    %cst_5 = arith.constant 0.000000e+00 : f32
    %7 = vector.broadcast %cst_5 : f32 to vector<16x128xf32>
    %8 = arith.maximumf %6, %7 : vector<16x128xf32>
    %9 = arith.truncf %8 : vector<16x128xf32> to vector<16x128xbf16>
    %c0_6 = arith.constant 0 : index
    %c0_7 = arith.constant 0 : index
    %10 = vector.load %arg4[%c0_6, %c0_7] : memref<128x128xbf16, #tpu.memory_space<vmem>>, vector<128x128xbf16>
    %cst_8 = arith.constant dense<0.000000e+00> : vector<16x128xf32>
    %11 = tpu.matmul %9, %10, %cst_8 {dimension_numbers = #tpu.dot_dimension_numbers<[1], [0], [0], [1], [0, 0, 1, 1], [], []>} : vector<16x128xbf16>, vector<128x128xbf16>, vector<16x128xf32> -> vector<16x128xf32>
    %c0_9 = arith.constant 0 : index
    %c0_10 = arith.constant 0 : index
    %12 = vector.load %arg5[%c0_9, %c0_10] : memref<1x128xf32, #tpu.memory_space<vmem>>, vector<1x128xf32>
    %13 = vector.broadcast %12 : vector<1x128xf32> to vector<16x128xf32>
    %14 = arith.addf %11, %13 : vector<16x128xf32>
    %c0_11 = arith.constant 0 : index
    %c0_12 = arith.constant 0 : index
    %15 = vector.load %arg6[%c0_11, %c0_12] : memref<16x128xf32, #tpu.memory_space<vmem>>, vector<16x128xf32>
    tpu.vector_store %arg6[%c0_11, %c0_12], %14 {strides = array<i32>} : memref<16x128xf32, #tpu.memory_space<vmem>>, vector<16x128xf32>,
    return
  }
  func.func @transform_0(%arg0: i32) -> (i32, i32) {
    %c0_i32 = arith.constant 0 : i32
    %c0_i32_0 = arith.constant 0 : i32
    return %arg0, %c0_i32 : i32, i32
  }
  func.func @transform_1(%arg0: i32) -> (i32, i32) {
    %c0_i32 = arith.constant 0 : i32
    %c0_i32_0 = arith.constant 0 : i32
    %c0_i32_1 = arith.constant 0 : i32
    return %c0_i32, %c0_i32_0 : i32, i32
  }
  func.func @transform_2(%arg0: i32) -> (i32, i32) {
    %c0_i32 = arith.constant 0 : i32
    %c0_i32_0 = arith.constant 0 : i32
    %c0_i32_1 = arith.constant 0 : i32
    return %c0_i32, %c0_i32_0 : i32, i32
  }
  func.func @transform_3(%arg0: i32) -> (i32, i32) {
    %c0_i32 = arith.constant 0 : i32
    %c0_i32_0 = arith.constant 0 : i32
    %c0_i32_1 = arith.constant 0 : i32
    return %c0_i32, %c0_i32_0 : i32, i32
  }
  func.func @transform_4(%arg0: i32) -> (i32, i32) {
    %c0_i32 = arith.constant 0 : i32
    %c0_i32_0 = arith.constant 0 : i32
    %c0_i32_1 = arith.constant 0 : i32
    return %c0_i32, %c0_i32_0 : i32, i32
  }
  func.func @transform_5(%arg0: i32) -> (i32, i32) {
    %c0_i32 = arith.constant 0 : i32
    %c0_i32_0 = arith.constant 0 : i32
    return %arg0, %c0_i32 : i32, i32
  }
}

</mosaic_0001>

<bundles_post_ra>
// kernel: autoencoder_forward.1
= control target key start
LH: loop header
LB: loop body
LE: loop exit
PB: predicated region body
PF: predicated region fallthrough
CT: control target
= control target key end

     0   :  { %10 = vsyncpa [#allocation3], 0  ;;  %s1279_s21 = smov [#allocation2]   ;;  %s1280_s23 = smov 64   ;;  %s1414_s0 = inlined_call_operand.vmem [shape: f32[2,1024], index: 0, kind: input, shape index: {}]   ;;  %s1415_s1 = inlined_call_operand.hbm [shape: bf16[1024,128], index: 1, kind: input, shape index: {}]   ;;  %s1416_s2 = inlined_call_operand.vmem [shape: f32[1,128], index: 2, kind: input, shape index: {}]   ;;  %s1417_s3 = inlined_call_operand.vmem [shape: bf16[128,128], index: 3, kind: input, shape index: {}]   ;;  %s1418_s4 = inlined_call_operand.vmem [shape: f32[1,128], index: 4, kind: input, shape index: {}]   ;;  %s1419_s5 = inlined_call_operand.vmem [shape: f32[2,128], index: 5, kind: output, shape index: {}]  }
   0x1   :  { %s17_s20 = sshll.u32 %s1415_s1, 4  ;;  %s19_s22 = sshll.u32 %s1279_s21, 4  ;;  %s18_s20 = int_to_ptr.hbm [resolvable:$true] %s17_s20  ;;  %s20_s22 = int_to_ptr.vmem [resolvable:$true] %s19_s22 }
   0x2   :  { %s1281_s24 = smov 4  }
   0x3   :  { %25 = dma.hbm_to_vmem [thread:$0]  %s18_s20, 8192, %s20_s22, [#allocation3], %s1280_s23, %s1280_s23, %s1281_s24  }
   0x4   :  { %1277 = dma.done.wait [#allocation3], 8192  }
   0x5   :  { %1278 = vsyncadd [#allocation3], 4294959104  ;;  %v1183_v0 = vld [vmem:[#allocation2 + $0x38] sm:$0xff]  ;;  %v1182_v4 = vld [vmem:[#allocation2 + $0x30] sm:$0xff] }
   0x6   :  { %v1191_v1 = vld [vmem:[#allocation2 + $0x78] sm:$0xff]  ;;  %647 = vmatpush.bf16.msra.mxu0 %v1183_v0  ;;  %v1190_v5 = vld [vmem:[#allocation2 + $0x70] sm:$0xff]  ;;  %v1181_v8 = vld [vmem:[#allocation2 + $0x28] sm:$0xff] }
   0x7   :  { %v1199_v2 = vld [vmem:[#allocation2 + $0xb8] sm:$0xff]  ;;  %661 = vmatpush.bf16.msra.mxu1 %v1191_v1  ;;  %v1198_v6 = vld [vmem:[#allocation2 + $0xb0] sm:$0xff]  ;;  %v1189_v9 = vld [vmem:[#allocation2 + $0x68] sm:$0xff] }
   0x8   :  { %v1207_v3 = vld [vmem:[#allocation2 + $0xf8] sm:$0xff]  ;;  %675 = vmatpush.bf16.msra.mxu2 %v1199_v2  ;;  %v1206_v7 = vld [vmem:[#allocation2 + $0xf0] sm:$0xff]  ;;  %v1197_v10 = vld [vmem:[#allocation2 + $0xa8] sm:$0xff] }
   0x9   :  { %689 = vmatpush.bf16.msra.mxu3 %v1207_v3  ;;  %v1205_v11 = vld [vmem:[#allocation2 + $0xe8] sm:$0xff]  ;;  %v1180_v12 = vld [vmem:[#allocation2 + $0x20] sm:$0xff]  ;;  %v1179_v16 = vld [vmem:[#allocation2 + $0x18] sm:$0xff] }
   0xa   :  { %648 = vmatpush.bf16.msra.mxu0 %v1182_v4  ;;  %v1188_v13 = vld [vmem:[#allocation2 + $0x60] sm:$0xff]  ;;  %v36_v17 = vld [vmem:[%s1414_s0] sm:$0xff]  ;;  %v38_v18 = vld [vmem:[%s1414_s0 + $0x10] sm:$0xff] }
   0xb   :  { %662 = vmatpush.bf16.msra.mxu1 %v1190_v5  ;;  %v1196_v14 = vld [vmem:[#allocation2 + $0xa0] sm:$0xff]  ;;  %v1187_v19 = vld [vmem:[#allocation2 + $0x58] sm:$0xff]  ;;  %v42_v21 = vld [vmem:[%s1414_s0 + $0x30] sm:$0xff]  ;;  %68 = vst [vmem:[#allocation1] ss:$4 sm:$0xff] %v36_v17 }
   0xc   :  { %676 = vmatpush.bf16.msra.mxu2 %v1198_v6  ;;  %v1204_v15 = vld [vmem:[#allocation2 + $0xe0] sm:$0xff]  ;;  %v40_v20 = vld [vmem:[%s1414_s0 + $0x20] sm:$0xff]  ;;  %70 = vst [vmem:[#allocation1 + $0x1] ss:$4 sm:$0xff] %v38_v18  ;;  %v1178_v24 = vld [vmem:[#allocation2 + $0x10] sm:$0xff] }
   0xd   :  { %690 = vmatpush.bf16.msra.mxu3 %v1206_v7  ;;  %v1195_v22 = vld [vmem:[#allocation2 + $0x98] sm:$0xff]  ;;  %72 = vst [vmem:[#allocation1 + $0x2] ss:$4 sm:$0xff] %v40_v20  ;;  %v1186_v25 = vld [vmem:[#allocation2 + $0x50] sm:$0xff]  ;;  %v1177_v28 = vld [vmem:[#allocation2 + $0x8] sm:$0xff] }
   0xe   :  { %649 = vmatpush.bf16.msra.mxu0 %v1181_v8  ;;  %v1203_v23 = vld [vmem:[#allocation2 + $0xd8] sm:$0xff]  ;;  %74 = vst [vmem:[#allocation1 + $0x3] ss:$4 sm:$0xff] %v42_v21  ;;  %v1194_v26 = vld [vmem:[#allocation2 + $0x90] sm:$0xff]  ;;  %v1185_v29 = vld [vmem:[#allocation2 + $0x48] sm:$0xff] }
   0xf   :  { %663 = vmatpush.bf16.msra.mxu1 %v1189_v9  ;;  %v1202_v27 = vld [vmem:[#allocation2 + $0xd0] sm:$0xff]  ;;  %v37_v30 = vld [vmem:[%s1414_s0 + $0x8] sm:$0xff]  ;;  %v1193_v31 = vld [vmem:[#allocation2 + $0x88] sm:$0xff] }
  0x10   :  { %677 = vmatpush.bf16.msra.mxu2 %v1197_v10  ;;  %v1201_v32 = vld [vmem:[#allocation2 + $0xc8] sm:$0xff]  ;;  %v39_v33 = vld [vmem:[%s1414_s0 + $0x18] sm:$0xff]  ;;  %76 = vst [vmem:[#allocation1 + $0x20] ss:$4 sm:$0xff] %v37_v30  ;;  %v44_v34 = vld [vmem:[%s1414_s0 + $0x40] sm:$0xff] }
  0x11   :  { %691 = vmatpush.bf16.msra.mxu3 %v1205_v11  ;;  %v46_v35 = vld [vmem:[%s1414_s0 + $0x50] sm:$0xff]  ;;  %v48_v36 = vld [vmem:[%s1414_s0 + $0x60] sm:$0xff]  ;;  %78 = vst [vmem:[#allocation1 + $0x21] ss:$4 sm:$0xff] %v39_v33  ;;  %v1176_v37 = vld [vmem:[#allocation2] sm:$0xff] }
  0x12   :  { %650 = vmatpush.bf16.msra.mxu0 %v1180_v12  ;;  %v1184_v42 = vld [vmem:[#allocation2 + $0x40] sm:$0xff]  ;;  %v50_v44 = vld [vmem:[%s1414_s0 + $0x70] sm:$0xff]  ;;  %v1215_v46 = vld [vmem:[#allocation2 + $0x138] sm:$0xff] }
  0x13   :  { %664 = vmatpush.bf16.msra.mxu1 %v1188_v13  ;;  %v1192_v43 = vld [vmem:[#allocation2 + $0x80] sm:$0xff]  ;;  %v1223_v48 = vld [vmem:[#allocation2 + $0x178] sm:$0xff]  ;;  %v43_v49 = vld [vmem:[%s1414_s0 + $0x38] sm:$0xff] }
  0x14   :  { %678 = vmatpush.bf16.msra.mxu2 %v1196_v14  ;;  %v1200_v45 = vld [vmem:[#allocation2 + $0xc0] sm:$0xff]  ;;  %v1231_v50 = vld [vmem:[#allocation2 + $0x1b8] sm:$0xff]  ;;  %82 = vst [vmem:[#allocation1 + $0x23] ss:$4 sm:$0xff] %v43_v49  ;;  %v1214_v52 = vld [vmem:[#allocation2 + $0x130] sm:$0xff] }
  0x15   :  { %692 = vmatpush.bf16.msra.mxu3 %v1204_v15  ;;  %v83_v38 = vld.sshfl [vmem:[#allocation1] sm:$0xff pattern:$0x73625140]  ;;  %v1342_v39 = vld.sshfl [vmem:[#allocation1 + $0x8] sm:$0xff pattern:$0x73625140] }
  0x16   :  { %651 = vmatpush.bf16.msra.mxu0 %v1179_v16  ;;  %v85_v40 = vld.sshfl [vmem:[#allocation1 + $0x10] sm:$0xff pattern:$0x73625140]  ;;  %v1344_v41 = vld.sshfl [vmem:[#allocation1 + $0x18] sm:$0xff pattern:$0x73625140] }
  0x17   :  { %665 = vmatpush.bf16.msra.mxu1 %v1187_v19  ;;  %91 = vst [vmem:[#allocation1] ss:$4 sm:$0xff] %v44_v34  ;;  %v41_v47 = vld [vmem:[%s1414_s0 + $0x28] sm:$0xff]  ;;  %v1239_v51 = vld [vmem:[#allocation2 + $0x1f8] sm:$0xff]  ;;  %v1222_v53 = vld [vmem:[#allocation2 + $0x170] sm:$0xff] }
  0x18   :  { %679 = vmatpush.bf16.msra.mxu2 %v1195_v22  ;;  %92 = vst [vmem:[#allocation1 + $0x1] ss:$4 sm:$0xff] %v46_v35  ;;  %v1230_v54 = vld [vmem:[#allocation2 + $0x1b0] sm:$0xff]  ;;  %v1213_v56 = vld [vmem:[#allocation2 + $0x128] sm:$0xff]  ;;  %v45_v60 = vld [vmem:[%s1414_s0 + $0x48] sm:$0xff] }
  0x19   :  { %693 = vmatpush.bf16.msra.mxu3 %v1203_v23  ;;  %93 = vst [vmem:[#allocation1 + $0x2] ss:$4 sm:$0xff] %v48_v36  ;;  %v1238_v55 = vld [vmem:[#allocation2 + $0x1f0] sm:$0xff]  ;;  %v1221_v57 = vld [vmem:[#allocation2 + $0x168] sm:$0xff]  ;;  %v49_v4 = vld [vmem:[%s1414_s0 + $0x68] sm:$0xff] }
  0x1a   :  { %652 = vmatpush.bf16.msra.mxu0 %v1178_v24  ;;  %94 = vst [vmem:[#allocation1 + $0x3] ss:$4 sm:$0xff] %v50_v44  ;;  %v1229_v58 = vld [vmem:[#allocation2 + $0x1a8] sm:$0xff]  ;;  %v47_v63 = vld [vmem:[%s1414_s0 + $0x58] sm:$0xff]  ;;  %v1212_v11 = vld [vmem:[#allocation2 + $0x120] sm:$0xff] }
  0x1b   :  { %666 = vmatpush.bf16.msra.mxu1 %v1186_v25  ;;  %80 = vst [vmem:[#allocation1 + $0x22] ss:$4 sm:$0xff] %v41_v47  ;;  %v1237_v59 = vld [vmem:[#allocation2 + $0x1e8] sm:$0xff]  ;;  %v1220_v12 = vld [vmem:[#allocation2 + $0x160] sm:$0xff]  ;;  %v51_v13 = vld [vmem:[%s1414_s0 + $0x78] sm:$0xff] }
  0x1c   :  { %680 = vmatpush.bf16.msra.mxu2 %v1194_v26  ;;  %v1228_v14 = vld [vmem:[#allocation2 + $0x1a0] sm:$0xff]  ;;  %v1211_v16 = vld [vmem:[#allocation2 + $0x118] sm:$0xff]  ;;  %v1210_v20 = vld [vmem:[#allocation2 + $0x110] sm:$0xff] }
  0x1d   :  { %694 = vmatpush.bf16.msra.mxu3 %v1202_v27  ;;  %v1236_v15 = vld [vmem:[#allocation2 + $0x1e0] sm:$0xff]  ;;  %v1219_v17 = vld [vmem:[#allocation2 + $0x158] sm:$0xff]  ;;  %v1218_v21 = vld [vmem:[#allocation2 + $0x150] sm:$0xff] }
  0x1e   :  { %653 = vmatpush.bf16.msra.mxu0 %v1177_v28  ;;  %v1227_v18 = vld [vmem:[#allocation2 + $0x198] sm:$0xff]  ;;  %v1226_v22 = vld [vmem:[#allocation2 + $0x190] sm:$0xff]  ;;  %v1209_v24 = vld [vmem:[#allocation2 + $0x108] sm:$0xff] }
  0x1f   :  { %667 = vmatpush.bf16.msra.mxu1 %v1185_v29  ;;  %v1235_v19 = vld [vmem:[#allocation2 + $0x1d8] sm:$0xff]  ;;  %v1234_v23 = vld [vmem:[#allocation2 + $0x1d0] sm:$0xff]  ;;  %v1217_v25 = vld [vmem:[#allocation2 + $0x148] sm:$0xff] }
  0x20   :  { %681 = vmatpush.bf16.msra.mxu2 %v1193_v31  ;;  %v1225_v26 = vld [vmem:[#allocation2 + $0x188] sm:$0xff]  ;;  %v1208_v28 = vld [vmem:[#allocation2 + $0x100] sm:$0xff]  ;;  %v1243_v44 = vld [vmem:[%s1417_s3 + $0x18] sm:$0xff] }
  0x21   :  { %695 = vmatpush.bf16.msra.mxu3 %v1201_v32  ;;  %v101_v61 = vld.sshfl [vmem:[#allocation1 + $0x10] sm:$0xff pattern:$0x73625140]  ;;  %v99_v62 = vld.sshfl [vmem:[#allocation1] sm:$0xff pattern:$0x73625140] }
  0x22   :  { %654 = vmatpush.bf16.msra.mxu0 %v1176_v37  ;;  %v125_v0 = vpack.c.bf16 %v101_v61, %v85_v40  ;;  %v123_v1 = vpack.c.bf16 %v99_v62, %v83_v38  ;;  %v102_v2 = vld.sshfl [vmem:[#allocation1 + $0x18] sm:$0xff pattern:$0x73625140]  ;;  %v100_v3 = vld.sshfl [vmem:[#allocation1 + $0x8] sm:$0xff pattern:$0x73625140] }
  0x23   :  { %668 = vmatpush.bf16.msra.mxu1 %v1184_v42  ;;  %v126_v5 = vpack.c.bf16 %v102_v2, %v1344_v41  ;;  %v124_v6 = vpack.c.bf16 %v100_v3, %v1342_v39  ;;  %v1366_v7 = vld.sshfl [vmem:[#allocation1 + $0x20] sm:$0xff pattern:$0x73625140]  ;;  %v1368_v8 = vld.sshfl [vmem:[#allocation1 + $0x28] sm:$0xff pattern:$0x73625140] }
  0x24   :  { %682 = vmatpush.bf16.msra.mxu2 %v1192_v43  ;;  %v1370_v9 = vld.sshfl [vmem:[#allocation1 + $0x30] sm:$0xff pattern:$0x73625140]  ;;  %v1372_v10 = vld.sshfl [vmem:[#allocation1 + $0x38] sm:$0xff pattern:$0x73625140] }
  0x25   :  { %696 = vmatpush.bf16.msra.mxu3 %v1200_v45  ;;  %655 = vmatmul.bf16.vlgmr.msra.gmra.mxu0 %v123_v1  ;;  %95 = vst [vmem:[#allocation1 + $0x20] ss:$4 sm:$0xff] %v45_v60  ;;  %v1233_v27 = vld [vmem:[#allocation2 + $0x1c8] sm:$0xff]  ;;  %v1216_v29 = vld [vmem:[#allocation2 + $0x140] sm:$0xff]  ;;  %v1247_v40 = vld [vmem:[%s1417_s3 + $0x38] sm:$0xff] }
  0x26   :  { %703 = vmatpush.bf16.msrb.mxu0 %v1215_v46  ;;  %96 = vst [vmem:[#allocation1 + $0x21] ss:$4 sm:$0xff] %v47_v63  ;;  %669 = vmatmul.bf16.vlgmr.msra.gmra.mxu1 %v124_v6  ;;  %v1224_v30 = vld [vmem:[#allocation2 + $0x180] sm:$0xff]  ;;  %v1246_v41 = vld [vmem:[%s1417_s3 + $0x30] sm:$0xff]  ;;  %v1244_v43 = vld [vmem:[%s1417_s3 + $0x20] sm:$0xff] }
  0x27   :  { %717 = vmatpush.bf16.msrb.mxu1 %v1223_v48  ;;  %683 = vmatmul.bf16.vlgmr.msra.gmra.mxu2 %v125_v0  ;;  %97 = vst [vmem:[#allocation1 + $0x22] ss:$4 sm:$0xff] %v49_v4  ;;  %v1232_v31 = vld [vmem:[#allocation2 + $0x1c0] sm:$0xff]  ;;  %v1242_v45 = vld [vmem:[%s1417_s3 + $0x10] sm:$0xff]  ;;  %v1240_v49 = vld [vmem:[%s1417_s3] sm:$0xff] }
  0x28   :  { %731 = vmatpush.bf16.msrb.mxu2 %v1231_v50  ;;  %697 = vmatmul.bf16.vlgmr.msra.gmra.mxu3 %v126_v5  ;;  %98 = vst [vmem:[#allocation1 + $0x23] ss:$4 sm:$0xff] %v51_v13  ;;  %v1245_v42 = vld [vmem:[%s1417_s3 + $0x28] sm:$0xff]  ;;  %v1251_v50 = vld [vmem:[%s1416_s2] ss:$0 sm:$0xff] }
  0x29   :  { %745 = vmatpush.bf16.msrb.mxu3 %v1239_v51  ;;  %v1241_v47 = vld [vmem:[%s1417_s3 + $0x8] sm:$0xff] }
  0x2a   :  { %704 = vmatpush.bf16.msrb.mxu0 %v1214_v52 }
  0x2b   :  { %718 = vmatpush.bf16.msrb.mxu1 %v1222_v53 }
  0x2c   :  { %732 = vmatpush.bf16.msrb.mxu2 %v1230_v54 }
  0x2d   :  { %746 = vmatpush.bf16.msrb.mxu3 %v1238_v55 }
  0x2e   :  { %705 = vmatpush.bf16.msrb.mxu0 %v1213_v56 }
  0x2f   :  { %719 = vmatpush.bf16.msrb.mxu1 %v1221_v57  ;;  %v103_v32 = vld.sshfl [vmem:[#allocation1 + $0x20] sm:$0xff pattern:$0x73625140]  ;;  %v104_v33 = vld.sshfl [vmem:[#allocation1 + $0x28] sm:$0xff pattern:$0x73625140] }
  0x30   :  { %733 = vmatpush.bf16.msrb.mxu2 %v1229_v58  ;;  %v105_v34 = vld.sshfl [vmem:[#allocation1 + $0x30] sm:$0xff pattern:$0x73625140]  ;;  %v106_v35 = vld.sshfl [vmem:[#allocation1 + $0x38] sm:$0xff pattern:$0x73625140]  ;;  %v127_v36 = vpack.c.bf16 %v103_v32, %v1366_v7  ;;  %v128_v37 = vpack.c.bf16 %v104_v33, %v1368_v8 }
  0x31   :  { %747 = vmatpush.bf16.msrb.mxu3 %v1237_v59  ;;  %v129_v38 = vpack.c.bf16 %v105_v34, %v1370_v9  ;;  %v130_v39 = vpack.c.bf16 %v106_v35, %v1372_v10 }
  0x32   :  { %706 = vmatpush.bf16.msrb.mxu0 %v1212_v11 }
  0x33   :  { %720 = vmatpush.bf16.msrb.mxu1 %v1220_v12 }
  0x34   :  { %734 = vmatpush.bf16.msrb.mxu2 %v1228_v14 }
  0x35   :  { %748 = vmatpush.bf16.msrb.mxu3 %v1236_v15 }
  0x36   :  { %707 = vmatpush.bf16.msrb.mxu0 %v1211_v16 }
  0x37   :  { %721 = vmatpush.bf16.msrb.mxu1 %v1219_v17 }
  0x38   :  { %735 = vmatpush.bf16.msrb.mxu2 %v1227_v18 }
  0x39   :  { %749 = vmatpush.bf16.msrb.mxu3 %v1235_v19 }
  0x3a   :  { %708 = vmatpush.bf16.msrb.mxu0 %v1210_v20  ;;  %v1252_v20 = vld [vmem:[%s1418_s4] ss:$0 sm:$0xff] }
  0x3b   :  { %722 = vmatpush.bf16.msrb.mxu1 %v1218_v21 }
  0x3c   :  { %736 = vmatpush.bf16.msrb.mxu2 %v1226_v22 }
  0x3d   :  { %750 = vmatpush.bf16.msrb.mxu3 %v1234_v23 }
  0x3e   :  { %709 = vmatpush.bf16.msrb.mxu0 %v1209_v24 }
  0x3f   :  { %723 = vmatpush.bf16.msrb.mxu1 %v1217_v25 }
  0x40   :  { %737 = vmatpush.bf16.msrb.mxu2 %v1225_v26 }
  0x41   :  { %751 = vmatpush.bf16.msrb.mxu3 %v1233_v27 }
  0x42   :  { %710 = vmatpush.bf16.msrb.mxu0 %v1208_v28 }
  0x43   :  { %724 = vmatpush.bf16.msrb.mxu1 %v1216_v29 }
  0x44   :  { %738 = vmatpush.bf16.msrb.mxu2 %v1224_v30 }
  0x45   :  { %752 = vmatpush.bf16.msrb.mxu3 %v1232_v31  ;;  %711 = vmatmul.bf16.vlgmr.msrb.gmra.mxu0 %v127_v36 }
  0x46   :  { %725 = vmatmul.bf16.vlgmr.msrb.gmra.mxu1 %v128_v37  ;;  %830 = vmatpush.bf16.msra.mxu0 %v1247_v40 }
  0x47   :  { %739 = vmatmul.bf16.vlgmr.msrb.gmra.mxu2 %v129_v38 }
  0x48   :  { %753 = vmatmul.bf16.vlgmr.msrb.gmra.mxu3 %v130_v39 }
  0x4a   :  { %831 = vmatpush.bf16.msra.mxu0 %v1246_v41 }
  0x4e   :  { %832 = vmatpush.bf16.msra.mxu0 %v1245_v42 }
  0x52   :  { %833 = vmatpush.bf16.msra.mxu0 %v1244_v43 }
  0x56   :  { %834 = vmatpush.bf16.msra.mxu0 %v1243_v44 }
  0x5a   :  { %835 = vmatpush.bf16.msra.mxu0 %v1242_v45 }
  0x5e   :  { %836 = vmatpush.bf16.msra.mxu0 %v1241_v47 }
  0x62   :  { %837 = vmatpush.bf16.msra.mxu0 %v1240_v49 }
  0xa2   :  { %v656_v46 = vpop.f32.mrf.mxu0 }
  0xa3   :  { %v670_v48 = vpop.f32.mrf.mxu1  ;;  %v657_v53 = vadd.f32 %v1251_v50, %v656_v46 }
  0xa5   :  { %v671_v56 = vadd.f32 %v670_v48, %v657_v53 }
  0xaa   :  { %v684_v51 = vpop.f32.mrf.mxu2  ;;  %v658_v54 = vpop.f32.mrf.mxu0 }
  0xab   :  { %v698_v52 = vpop.f32.mrf.mxu3  ;;  %v672_v55 = vpop.f32.mrf.mxu1  ;;  %v659_v57 = vadd.f32 %v1251_v50, %v658_v54  ;;  %v685_v60 = vadd.f32 %v684_v51, %v671_v56 }
  0xad   :  { %v673_v61 = vadd.f32 %v672_v55, %v659_v57  ;;  %v699_v0 = vadd.f32 %v698_v52, %v685_v60 }
  0xb2   :  { %v686_v58 = vpop.f32.mrf.mxu2 }
  0xb3   :  { %v700_v59 = vpop.f32.mrf.mxu3  ;;  %v687_v1 = vadd.f32 %v686_v58, %v673_v61 }
  0xb5   :  { %v701_v5 = vadd.f32 %v700_v59, %v687_v1 }
  0xc2   :  { %v712_v62 = vpop.f32.mrf.mxu0 }
  0xc3   :  { %v726_v63 = vpop.f32.mrf.mxu1  ;;  %v713_v2 = vadd.f32 %v712_v62, %v699_v0 }
  0xc5   :  { %v727_v7 = vadd.f32 %v726_v63, %v713_v2 }
  0xca   :  { %v740_v3 = vpop.f32.mrf.mxu2  ;;  %v714_v6 = vpop.f32.mrf.mxu0 }
  0xcb   :  { %v754_v4 = vpop.f32.mrf.mxu3  ;;  %v715_v8 = vadd.f32 %v714_v6, %v701_v5  ;;  %v741_v9 = vadd.f32 %v740_v3, %v727_v7  ;;  %v728_v10 = vpop.f32.mrf.mxu1 }
  0xcd   :  { %v729_v11 = vadd.f32 %v728_v10, %v715_v8  ;;  %v755_v13 = vadd.f32 %v754_v4, %v741_v9 }
  0xcf   :  { %v759_v17 = vmax.f32 %v755_v13, 0.0 }
  0xd2   :  { %v742_v12 = vpop.f32.mrf.mxu2 }
  0xd3   :  { %v743_v14 = vadd.f32 %v742_v12, %v729_v11  ;;  %v756_v15 = vpop.f32.mrf.mxu3 }
  0xd5   :  { %v757_v16 = vadd.f32 %v756_v15, %v743_v14 }
  0xd7   :  { %v760_v18 = vmax.f32 %v757_v16, 0.0 }
  0xd9   :  { %v761_v19 = vpack.c.bf16 %v760_v18, %v759_v17 }
  0xdb   :  { %838 = vmatmul.bf16.vlgmr.msra.gmra.mxu0 %v761_v19 }
 0x158   :  { %v839_v21 = vpop.f32.mrf.mxu0 }
 0x159   :  { %v840_v22 = vadd.f32 %v1252_v20, %v839_v21 }
 0x15b   :  { %844 = vst [vmem:[#allocation4] sm:$0xff] %v840_v22 }
 0x160   :  { %v841_v23 = vpop.f32.mrf.mxu0 }
 0x162   :  { %v864_v24 = vld [vmem:[#allocation4] sm:$0x3] }
 0x163   :  { %865 = vst [vmem:[%s1419_s5] sm:$0x3] %v864_v24 }
 0x164   :  { %883 = vsyncpa [#allocation3], 1 }

</bundles_post_ra>
